<compile_context>
chip_gen: v7x
topology: tpu7x:2x2x1
jax: 0.10.0
libtpu: 0.0.40
codegen_flags: <defaults>
</compile_context>

<pallas_src>
import functools
import math

import jax
import jax.numpy as jnp
from jax import lax
from jax.experimental import pallas as pl
from jax.experimental.pallas import tpu as pltpu


_VMEM_LIMIT = 32 * 1024 * 1024          # explicit scoped-VMEM budget (v7x-safe)


# ----------------------------------------------------------------------------
# tile selection helpers
# ----------------------------------------------------------------------------
def _pick_tile(dim, target, align):
    """Largest multiple of `align` that divides `dim` and is <= `target`;
    falls back to the full dim (always a legal block)."""
    if dim <= target:
        return dim
    t = (target // align) * align
    while t >= align:
        if dim % t == 0:
            return t
        t -= align
    return dim


def _attn_q_tile(s_q, s_kv, dk, dv, itemsize, with_weights,
                 budget_bytes=16 * 1024 * 1024):
    """Query-tile size so the attention step stays well inside the VMEM limit."""
    tq = _pick_tile(s_q, 1024, 8)
    while tq > 8:
        blocks = 2 * itemsize * (tq * (dk + dv) + s_kv * (dk + dv)
                                 + (tq * s_kv if with_weights else 0))
        temps = 4 * 4 * tq * s_kv          # f32 scores / exp / p intermediates
        if blocks + temps <= budget_bytes:
            break
        nxt = _pick_tile(s_q, tq // 2, 8)
        if nxt >= tq:
            break
        tq = nxt
    return tq


# ----------------------------------------------------------------------------
# Kernel 1: per-head Q/K/V projection, output written directly as (B, H, S, d)
# ----------------------------------------------------------------------------
def _head_proj_kernel(x_ref, w_ref, b_ref, o_ref, acc_ref, *, num_heads):
    kk = pl.program_id(2)

    @pl.when(kk == 0)
    def _():
        acc_ref[...] = jnp.zeros_like(acc_ref)

    x = x_ref[0]                                    # (ts, tk)
    # One MXU matmul per head; the x tile stays resident across all heads so x
    # is only read once per K step (no H-fold HBM re-read).
    for h in range(num_heads):
        acc_ref[h] += jnp.dot(x, w_ref[h], preferred_element_type=jnp.float32)

    @pl.when(kk == pl.num_programs(2) - 1)
    def _():
        o_ref[0] = (acc_ref[...] + b_ref[...]).astype(o_ref.dtype)


def pallas_head_proj(x, w_h, b_h, *, ts=256, tk=512):
    """x: (B, S, E), w_h: (Hn, E, d), b_h: (Hn, 1, d) -> (B, Hn, S, d).

    Writes the projection output directly in per-head layout so no XLA
    split_heads transpose is needed downstream."""
    B, S, E = x.shape
    Hn, _, d = w_h.shape
    ts = _pick_tile(S, ts, 8)
    tk = _pick_tile(E, tk, 128)
    # keep the (Hn, tk, d) weight block (double buffered) within ~8 MiB
    while tk > 128 and 2 * Hn * tk * d * x.dtype.itemsize > 8 * 1024 * 1024:
        nxt = _pick_tile(E, tk // 2, 128)
        if nxt >= tk:
            break
        tk = nxt

    kern = functools.partial(_head_proj_kernel, num_heads=Hn)
    return pl.pallas_call(
        kern,
        out_shape=jax.ShapeDtypeStruct((B, Hn, S, d), x.dtype),
        grid_spec=pltpu.PrefetchScalarGridSpec(
            num_scalar_prefetch=0,
            grid=(B, S // ts, E // tk),
            in_specs=[
                pl.BlockSpec((1, ts, tk), lambda b, s, kk: (b, s, kk)),
                pl.BlockSpec((Hn, tk, d), lambda b, s, kk: (0, kk, 0)),
                pl.BlockSpec((Hn, 1, d), lambda b, s, kk: (0, 0, 0)),
            ],
            out_specs=pl.BlockSpec((1, Hn, ts, d), lambda b, s, kk: (b, 0, s, 0)),
            scratch_shapes=[pltpu.VMEM((Hn, ts, d), jnp.float32)],
        ),
        compiler_params=pltpu.CompilerParams(
            dimension_semantics=("parallel", "parallel", "arbitrary"),
            vmem_limit_bytes=_VMEM_LIMIT),
    )(x, w_h, b_h)


# ----------------------------------------------------------------------------
# Kernel 2: scaled-dot-product attention, grid = (B, H, query blocks)
# ----------------------------------------------------------------------------
def _attn_kernel(q_ref, k_ref, v_ref, o_ref, *w_refs, scale, with_weights):
    q = q_ref[0, 0] * scale                         # (tq, dk), q pre-scaled
    k = k_ref[0, 0]                                  # (S_kv, dk)
    v = v_ref[0, 0]                                  # (S_kv, dv)

    # Contract on dk directly -- no explicit k transpose (no XLU vxpose).
    s = lax.dot_general(q, k, dimension_numbers=(((1,), (1,)), ((), ())),
                        preferred_element_type=jnp.float32)     # (tq, S_kv)

    # TODO(synk): optional attention mask (masked_fill with -inf) not
    # implemented; this matches the mask=None path of the PyTorch forward.

    m = jnp.max(s, axis=-1, keepdims=True)
    e = jnp.exp(s - m)
    denom = jnp.sum(e, axis=-1, keepdims=True)
    p = e * pl.reciprocal(denom, approx=True)        # EUP vrcp, ~free

    if with_weights:
        w_refs[0][0, 0] = p.astype(w_refs[0].dtype)

    o_ref[0, 0] = jnp.dot(p.astype(v.dtype), v,
                          preferred_element_type=jnp.float32).astype(o_ref.dtype)


def pallas_attention(q, k, v, *, num_heads, k_head_offset=0, return_weights=True):
    """q: (B, Hq, Sq, dk), k: (B, Hk, Skv, dk), v: (B, H, Skv, dv).

    The K index_map offsets the head index by `k_head_offset`, which lets a
    fused Q|K projection output (head axis of size 2H) be passed as both the
    q and k operands.  Returns (attn (B,H,Sq,dv), weights (B,H,Sq,Skv)|None).
    """
    B, _, S_q, dk = q.shape
    S_kv = k.shape[2]
    dv = v.shape[-1]
    scale = 1.0 / math.sqrt(dk)

    tq = _attn_q_tile(S_q, S_kv, dk, dv, q.dtype.itemsize, return_weights)
    grid = (B, num_heads, S_q // tq)

    in_specs = [
        pl.BlockSpec((1, 1, tq, dk), lambda b, h, qi: (b, h, qi, 0)),
        pl.BlockSpec((1, 1, S_kv, dk), lambda b, h, qi: (b, h + k_head_offset, 0, 0)),
        pl.BlockSpec((1, 1, S_kv, dv), lambda b, h, qi: (b, h, 0, 0)),
    ]
    # TODO(synk): for very long S_kv, also block the key axis (flash-style
    # online softmax) instead of holding full-S_kv k/v per step.
    if return_weights:
        out_shape = (jax.ShapeDtypeStruct((B, num_heads, S_q, dv), q.dtype),
                     jax.ShapeDtypeStruct((B, num_heads, S_q, S_kv), q.dtype))
        out_specs = (pl.BlockSpec((1, 1, tq, dv), lambda b, h, qi: (b, h, qi, 0)),
                     pl.BlockSpec((1, 1, tq, S_kv), lambda b, h, qi: (b, h, qi, 0)))
    else:
        out_shape = jax.ShapeDtypeStruct((B, num_heads, S_q, dv), q.dtype)
        out_specs = pl.BlockSpec((1, 1, tq, dv), lambda b, h, qi: (b, h, qi, 0))

    kern = functools.partial(_attn_kernel, scale=scale,
                             with_weights=return_weights)
    res = pl.pallas_call(
        kern,
        out_shape=out_shape,
        grid_spec=pltpu.PrefetchScalarGridSpec(
            num_scalar_prefetch=0,
            grid=grid,
            in_specs=in_specs,
            out_specs=out_specs,
        ),
        compiler_params=pltpu.CompilerParams(
            dimension_semantics=("parallel", "parallel", "parallel"),
            vmem_limit_bytes=_VMEM_LIMIT),
    )(q, k, v)

    if return_weights:
        return res[0], res[1]
    return res, None


# ----------------------------------------------------------------------------
# Kernel 3: output projection with fused head-merge
#   out[b, s, :] = sum_h attn[b, h, s, :] @ W_o[h] + b_o
# ----------------------------------------------------------------------------
def _out_proj_kernel(a_ref, w_ref, b_ref, o_ref, acc_ref):
    h = pl.program_id(3)

    @pl.when(h == 0)
    def _():
        acc_ref[...] = jnp.zeros_like(acc_ref)

    acc_ref[...] += jnp.dot(a_ref[0, 0], w_ref[0],
                            preferred_element_type=jnp.float32)

    @pl.when(h == pl.num_programs(3) - 1)
    def _():
        o_ref[0] = (acc_ref[...] + b_ref[...]).astype(o_ref.dtype)


def pallas_out_proj(attn, w_o_h, b_o, *, ts=256, tn=1024):
    """attn: (B, H, S, dv), w_o_h: (H, dv, E), b_o: (E,) -> (B, S, E).

    Contracting over the head grid axis removes the XLA transpose + concat that
    would otherwise be needed to build the (B*S, H*dv) matrix.
    TODO(synk): for embed dims that are not multiples of 128 (e.g. the demo's
    E=32) the output stores are lane-masked; pad W_o/b_o to 128 lanes at
    parameter-prep time if this projection dominates."""
    B, H, S, dv = attn.shape
    E = w_o_h.shape[-1]
    ts = _pick_tile(S, ts, 8)
    tn = _pick_tile(E, tn, 128)
    while tn > 128 and 2 * dv * tn * attn.dtype.itemsize > 8 * 1024 * 1024:
        nxt = _pick_tile(E, tn // 2, 128)
        if nxt >= tn:
            break
        tn = nxt
    b2 = b_o.reshape(1, E)

    return pl.pallas_call(
        _out_proj_kernel,
        out_shape=jax.ShapeDtypeStruct((B, S, E), attn.dtype),
        grid_spec=pltpu.PrefetchScalarGridSpec(
            num_scalar_prefetch=0,
            grid=(B, S // ts, E // tn, H),
            in_specs=[
                pl.BlockSpec((1, 1, ts, dv), lambda b, s, n, h: (b, h, s, 0)),
                pl.BlockSpec((1, dv, tn), lambda b, s, n, h: (h, 0, n)),
                pl.BlockSpec((1, tn), lambda b, s, n, h: (0, n)),
            ],
            out_specs=pl.BlockSpec((1, ts, tn), lambda b, s, n, h: (b, s, n)),
            scratch_shapes=[pltpu.VMEM((ts, tn), jnp.float32)],
        ),
        compiler_params=pltpu.CompilerParams(
            dimension_semantics=("parallel", "parallel", "parallel", "arbitrary"),
            vmem_limit_bytes=_VMEM_LIMIT),
    )(attn, w_o_h, b2)


# ----------------------------------------------------------------------------
# Parameter preparation (done ONCE, outside the forward)
# ----------------------------------------------------------------------------
def prepare_params(params, num_heads, dtype=None):
    """Pre-reshape / pre-fuse all weights into kernel layouts (one-time cost)."""
    wq, bq = params["w_q"]
    wk, bk = params["w_k"]
    wv, bv = params["w_v"]
    wo, bo = params["w_o"]
    E, kdim = wq.shape
    vdim = wv.shape[1]
    assert kdim % num_heads == 0 and vdim % num_heads == 0
    dk, dv = kdim // num_heads, vdim // num_heads

    def heads(w, b, d):
        wh = w.reshape(E, num_heads, d).transpose(1, 0, 2)      # (H, E, d)
        bh = b.reshape(num_heads, 1, d)
        return wh, bh

    wq_h, bq_h = heads(wq, bq, dk)
    wk_h, bk_h = heads(wk, bk, dk)
    wv_h, bv_h = heads(wv, bv, dv)

    kp = {
        "w_q_h": wq_h, "b_q_h": bq_h,
        "w_k_h": wk_h, "b_k_h": bk_h,
        "w_v_h": wv_h, "b_v_h": bv_h,
        # fused Q|K weights for the self-attention fast path (q is k)
        "w_qk_h": jnp.concatenate([wq_h, wk_h], axis=0),        # (2H, E, dk)
        "b_qk_h": jnp.concatenate([bq_h, bk_h], axis=0),        # (2H, 1, dk)
        "w_o_h": wo.reshape(num_heads, dv, E),                   # (H, dv, E)
        "b_o": bo,
    }
    if dtype is not None:
        kp = jax.tree_util.tree_map(lambda a: a.astype(dtype), kp)
    return kp


# ----------------------------------------------------------------------------
# Full MultiHeadAttention forward
# ----------------------------------------------------------------------------
def multi_head_attention(kparams, q, k, v, *, num_heads, return_weights=True,
                         compute_dtype=None):
    """q, k, v: (B, S, embed_dim).  Returns (output (B,S,E), weights or None)."""
    same_qk, same_qv, same_kv = q is k, v is q, v is k
    if compute_dtype is not None and q.dtype != compute_dtype:
        q = q.astype(compute_dtype)
        k = q if same_qk else k.astype(compute_dtype)
        v = q if same_qv else (k if same_kv else v.astype(compute_dtype))

    if q is k:
        # self-attention fast path: one fused Q|K projection call, no extra
        # copies of the shared input.
        qk_h = pallas_head_proj(q, kparams["w_qk_h"], kparams["b_qk_h"])
        q_h, k_h, k_off = qk_h, qk_h, num_heads
    else:
        q_h = pallas_head_proj(q, kparams["w_q_h"], kparams["b_q_h"])
        k_h = pallas_head_proj(k, kparams["w_k_h"], kparams["b_k_h"])
        k_off = 0
    v_h = pallas_head_proj(v, kparams["w_v_h"], kparams["b_v_h"])

    attn, weights = pallas_attention(q_h, k_h, v_h, num_heads=num_heads,
                                     k_head_offset=k_off,
                                     return_weights=return_weights)

    out = pallas_out_proj(attn, kparams["w_o_h"], kparams["b_o"])
    return out, weights


# ----------------------------------------------------------------------------
# Pure-JAX reference (sanity check)
# ----------------------------------------------------------------------------
def reference_mha(params, q, k, v, *, num_heads):
    B, S, E = q.shape
    kdim = params["w_q"][0].shape[1]
    vdim = params["w_v"][0].shape[1]
    dk = kdim // num_heads
    dv = vdim // num_heads

    def lin(x, wb):
        w, b = wb
        return x @ w + b

    def split(x, hd):
        return x.reshape(B, -1, num_heads, hd).transpose(0, 2, 1, 3)

    qh = split(lin(q, params["w_q"]), dk)
    kh = split(lin(k, params["w_k"]), dk)
    vh = split(lin(v, params["w_v"]), dv)
    scores = jnp.einsum("bhqd,bhkd->bhqk", qh, kh) / math.sqrt(dk)
    weights = jax.nn.softmax(scores, axis=-1)
    attn = jnp.einsum("bhqk,bhkd->bhqd", weights, vh)
    concat = attn.transpose(0, 2, 1, 3).reshape(B, -1, vdim)
    out = lin(concat, params["w_o"])
    return out, weights


# ----------------------------------------------------------------------------
def init_params(key, embed_dim, kdim, vdim):
    ks = jax.random.split(key, 8)

    def linear(kw, kb, fan_in, fan_out):
        bound = 1.0 / math.sqrt(fan_in)
        w = jax.random.uniform(kw, (fan_in, fan_out), jnp.float32, -bound, bound)
        b = jax.random.uniform(kb, (fan_out,), jnp.float32, -bound, bound)
        return (w, b)

    return {
        "w_q": linear(ks[0], ks[1], embed_dim, kdim),
        "w_k": linear(ks[2], ks[3], embed_dim, kdim),
        "w_v": linear(ks[4], ks[5], embed_dim, vdim),
        "w_o": linear(ks[6], ks[7], vdim, embed_dim),
    }


if __name__ == "__main__":
    B, S, E = 2, 8, 32
    KDIM, VDIM, H = 256, 512, 8

    key = jax.random.PRNGKey(0)
    kp_, kq_, kk_, kv_ = jax.random.split(key, 4)
    params = init_params(kp_, E, KDIM, VDIM)
    kparams = prepare_params(params, H)               # one-time layout prep

    q = jax.random.normal(kq_, (B, S, E), jnp.float32)
    k = jax.random.normal(kk_, (B, S, E), jnp.float32)
    v = jax.random.normal(kv_, (B, S, E), jnp.float32)

    # 1) general path (distinct q / k / v), weights returned (module semantics)
    out, weights = multi_head_attention(kparams, q, k, v, num_heads=H)
    out = jax.block_until_ready(out)
    weights = jax.block_until_ready(weights)
    ref_out, ref_w = reference_mha(params, q, k, v, num_heads=H)
    assert out.shape == (B, S, E)
    assert weights.shape == (B, H, S, S)
    assert jnp.allclose(out, ref_out, atol=1e-3, rtol=1e-3)
    assert jnp.allclose(weights, ref_w, atol=1e-3, rtol=1e-3)

    # 2) self-attention fast path (fused Q|K projection), weights skipped
    out_sa, w_sa = multi_head_attention(kparams, q, q, q, num_heads=H,
                                        return_weights=False)
    out_sa = jax.block_until_ready(out_sa)
    ref_sa, _ = reference_mha(params, q, q, q, num_heads=H)
    assert w_sa is None
    assert jnp.allclose(out_sa, ref_sa, atol=1e-3, rtol=1e-3)

    # 3) bf16 MXU path (v6e/v7x): bf16 inputs/weights, f32 accumulation
    kparams_bf16 = prepare_params(params, H, dtype=jnp.bfloat16)
    out_bf, _ = multi_head_attention(kparams_bf16, q, k, v, num_heads=H,
                                     return_weights=False,
                                     compute_dtype=jnp.bfloat16)
    out_bf = jax.block_until_ready(out_bf).astype(jnp.float32)
    assert jnp.isfinite(out_bf).all()
    assert jnp.mean(jnp.abs(out_bf - ref_out)) < 0.05

    print("KERNEL_OK")
</pallas_src>

<mosaic_0001>
module attributes {stable_mosaic.version = 11 : i64} {
  func.func @_head_proj_kernel(%arg0: i32, %arg1: i32, %arg2: i32, %arg3: memref<1x8x32xf32, #tpu.memory_space<vmem>>, %arg4: memref<8x32x32xf32, #tpu.memory_space<vmem>>, %arg5: memref<8x1x32xf32, #tpu.memory_space<vmem>>, %arg6: memref<1x8x8x32xf32, #tpu.memory_space<vmem>>, %arg7: memref<8x8x32xf32, #tpu.memory_space<vmem>>) attributes {dimension_semantics = [#tpu.dimension_semantics<parallel>, #tpu.dimension_semantics<parallel>, #tpu.dimension_semantics<arbitrary>], iteration_bounds = array<i64: 2, 1, 1>, scalar_prefetch = 0 : i64, scratch_operands = 1 : i64, tpu.core_type = #tpu.core_type<tc>, window_params = [{transform_indices = @transform_0, window_bounds = array<i64: 1, 8, 32>}, {transform_indices = @transform_1, window_bounds = array<i64: 8, 32, 32>}, {pipeline_mode = #tpu.pipeline_mode<synchronous>, transform_indices = @transform_2, window_bounds = array<i64: 8, 1, 32>}, {transform_indices = @transform_3, window_bounds = array<i64: 1, 8, 8, 32>}]} {
    %c0_i32 = arith.constant 0 : i32
    %0 = arith.cmpi eq, %arg2, %c0_i32 : i32
    %1 = arith.extui %0 : i1 to i32
    %c0_i32_0 = arith.constant 0 : i32
    %2 = arith.cmpi ne, %1, %c0_i32_0 : i32
    scf.if %2 {
      %cst_77 = arith.constant 0.000000e+00 : f32
      %80 = vector.broadcast %cst_77 : f32 to vector<8x8x32xf32>
      %c0_78 = arith.constant 0 : index
      %c0_79 = arith.constant 0 : index
      %c0_80 = arith.constant 0 : index
      %81 = vector.load %arg7[%c0_78, %c0_79, %c0_80] : memref<8x8x32xf32, #tpu.memory_space<vmem>>, vector<8x8x32xf32>
      tpu.vector_store %arg7[%c0_78, %c0_79, %c0_80], %80 {strides = array<i32>} : memref<8x8x32xf32, #tpu.memory_space<vmem>>, vector<8x8x32xf32>,
    } else {
    }
    %c0 = arith.constant 0 : index
    %c0_1 = arith.constant 0 : index
    %c0_2 = arith.constant 0 : index
    %3 = vector.load %arg3[%c0, %c0_1, %c0_2] : memref<1x8x32xf32, #tpu.memory_space<vmem>>, vector<1x8x32xf32>
    %4 = vector.shape_cast %3 : vector<1x8x32xf32> to vector<8x32xf32>
    %c0_3 = arith.constant 0 : index
    %c0_4 = arith.constant 0 : index
    %c0_5 = arith.constant 0 : index
    %5 = vector.load %arg7[%c0_3, %c0_4, %c0_5] : memref<8x8x32xf32, #tpu.memory_space<vmem>>, vector<1x8x32xf32>
    %6 = vector.shape_cast %5 : vector<1x8x32xf32> to vector<8x32xf32>
    %c0_6 = arith.constant 0 : index
    %c0_7 = arith.constant 0 : index
    %c0_8 = arith.constant 0 : index
    %7 = vector.load %arg4[%c0_6, %c0_7, %c0_8] : memref<8x32x32xf32, #tpu.memory_space<vmem>>, vector<1x32x32xf32>
    %8 = vector.shape_cast %7 : vector<1x32x32xf32> to vector<32x32xf32>
    %cst = arith.constant dense<0.000000e+00> : vector<8x32xf32>
    %9 = tpu.matmul %4, %8, %cst {dimension_numbers = #tpu.dot_dimension_numbers<[1], [0], [0], [1], [0, 0, 1, 1], [], []>} : vector<8x32xf32>, vector<32x32xf32>, vector<8x32xf32> -> vector<8x32xf32>
    %10 = arith.addf %6, %9 : vector<8x32xf32>
    %c0_9 = arith.constant 0 : index
    %c0_10 = arith.constant 0 : index
    %c0_11 = arith.constant 0 : index
    %11 = vector.load %arg7[%c0_9, %c0_10, %c0_11] : memref<8x8x32xf32, #tpu.memory_space<vmem>>, vector<1x8x32xf32>
    %12 = vector.shape_cast %11 : vector<1x8x32xf32> to vector<8x32xf32>
    %13 = vector.shape_cast %10 : vector<8x32xf32> to vector<1x8x32xf32>
    tpu.vector_store %arg7[%c0_9, %c0_10, %c0_11], %13 {strides = array<i32>} : memref<8x8x32xf32, #tpu.memory_space<vmem>>, vector<1x8x32xf32>,
    %c1 = arith.constant 1 : index
    %c0_12 = arith.constant 0 : index
    %c0_13 = arith.constant 0 : index
    %14 = vector.load %arg7[%c1, %c0_12, %c0_13] : memref<8x8x32xf32, #tpu.memory_space<vmem>>, vector<1x8x32xf32>
    %15 = vector.shape_cast %14 : vector<1x8x32xf32> to vector<8x32xf32>
    %c1_14 = arith.constant 1 : index
    %c0_15 = arith.constant 0 : index
    %c0_16 = arith.constant 0 : index
    %16 = vector.load %arg4[%c1_14, %c0_15, %c0_16] : memref<8x32x32xf32, #tpu.memory_space<vmem>>, vector<1x32x32xf32>
    %17 = vector.shape_cast %16 : vector<1x32x32xf32> to vector<32x32xf32>
    %cst_17 = arith.constant dense<0.000000e+00> : vector<8x32xf32>
    %18 = tpu.matmul %4, %17, %cst_17 {dimension_numbers = #tpu.dot_dimension_numbers<[1], [0], [0], [1], [0, 0, 1, 1], [], []>} : vector<8x32xf32>, vector<32x32xf32>, vector<8x32xf32> -> vector<8x32xf32>
    %19 = arith.addf %15, %18 : vector<8x32xf32>
    %c1_18 = arith.constant 1 : index
    %c0_19 = arith.constant 0 : index
    %c0_20 = arith.constant 0 : index
    %20 = vector.load %arg7[%c1_18, %c0_19, %c0_20] : memref<8x8x32xf32, #tpu.memory_space<vmem>>, vector<1x8x32xf32>
    %21 = vector.shape_cast %20 : vector<1x8x32xf32> to vector<8x32xf32>
    %22 = vector.shape_cast %19 : vector<8x32xf32> to vector<1x8x32xf32>
    tpu.vector_store %arg7[%c1_18, %c0_19, %c0_20], %22 {strides = array<i32>} : memref<8x8x32xf32, #tpu.memory_space<vmem>>, vector<1x8x32xf32>,
    %c2 = arith.constant 2 : index
    %c0_21 = arith.constant 0 : index
    %c0_22 = arith.constant 0 : index
    %23 = vector.load %arg7[%c2, %c0_21, %c0_22] : memref<8x8x32xf32, #tpu.memory_space<vmem>>, vector<1x8x32xf32>
    %24 = vector.shape_cast %23 : vector<1x8x32xf32> to vector<8x32xf32>
    %c2_23 = arith.constant 2 : index
    %c0_24 = arith.constant 0 : index
    %c0_25 = arith.constant 0 : index
    %25 = vector.load %arg4[%c2_23, %c0_24, %c0_25] : memref<8x32x32xf32, #tpu.memory_space<vmem>>, vector<1x32x32xf32>
    %26 = vector.shape_cast %25 : vector<1x32x32xf32> to vector<32x32xf32>
    %cst_26 = arith.constant dense<0.000000e+00> : vector<8x32xf32>
    %27 = tpu.matmul %4, %26, %cst_26 {dimension_numbers = #tpu.dot_dimension_numbers<[1], [0], [0], [1], [0, 0, 1, 1], [], []>} : vector<8x32xf32>, vector<32x32xf32>, vector<8x32xf32> -> vector<8x32xf32>
    %28 = arith.addf %24, %27 : vector<8x32xf32>
    %c2_27 = arith.constant 2 : index
    %c0_28 = arith.constant 0 : index
    %c0_29 = arith.constant 0 : index
    %29 = vector.load %arg7[%c2_27, %c0_28, %c0_29] : memref<8x8x32xf32, #tpu.memory_space<vmem>>, vector<1x8x32xf32>
    %30 = vector.shape_cast %29 : vector<1x8x32xf32> to vector<8x32xf32>
    %31 = vector.shape_cast %28 : vector<8x32xf32> to vector<1x8x32xf32>
    tpu.vector_store %arg7[%c2_27, %c0_28, %c0_29], %31 {strides = array<i32>} : memref<8x8x32xf32, #tpu.memory_space<vmem>>, vector<1x8x32xf32>,
    %c3 = arith.constant 3 : index
    %c0_30 = arith.constant 0 : index
    %c0_31 = arith.constant 0 : index
    %32 = vector.load %arg7[%c3, %c0_30, %c0_31] : memref<8x8x32xf32, #tpu.memory_space<vmem>>, vector<1x8x32xf32>
    %33 = vector.shape_cast %32 : vector<1x8x32xf32> to vector<8x32xf32>
    %c3_32 = arith.constant 3 : index
    %c0_33 = arith.constant 0 : index
    %c0_34 = arith.constant 0 : index
    %34 = vector.load %arg4[%c3_32, %c0_33, %c0_34] : memref<8x32x32xf32, #tpu.memory_space<vmem>>, vector<1x32x32xf32>
    %35 = vector.shape_cast %34 : vector<1x32x32xf32> to vector<32x32xf32>
    %cst_35 = arith.constant dense<0.000000e+00> : vector<8x32xf32>
    %36 = tpu.matmul %4, %35, %cst_35 {dimension_numbers = #tpu.dot_dimension_numbers<[1], [0], [0], [1], [0, 0, 1, 1], [], []>} : vector<8x32xf32>, vector<32x32xf32>, vector<8x32xf32> -> vector<8x32xf32>
    %37 = arith.addf %33, %36 : vector<8x32xf32>
    %c3_36 = arith.constant 3 : index
    %c0_37 = arith.constant 0 : index
    %c0_38 = arith.constant 0 : index
    %38 = vector.load %arg7[%c3_36, %c0_37, %c0_38] : memref<8x8x32xf32, #tpu.memory_space<vmem>>, vector<1x8x32xf32>
    %39 = vector.shape_cast %38 : vector<1x8x32xf32> to vector<8x32xf32>
    %40 = vector.shape_cast %37 : vector<8x32xf32> to vector<1x8x32xf32>
    tpu.vector_store %arg7[%c3_36, %c0_37, %c0_38], %40 {strides = array<i32>} : memref<8x8x32xf32, #tpu.memory_space<vmem>>, vector<1x8x32xf32>,
    %c4 = arith.constant 4 : index
    %c0_39 = arith.constant 0 : index
    %c0_40 = arith.constant 0 : index
    %41 = vector.load %arg7[%c4, %c0_39, %c0_40] : memref<8x8x32xf32, #tpu.memory_space<vmem>>, vector<1x8x32xf32>
    %42 = vector.shape_cast %41 : vector<1x8x32xf32> to vector<8x32xf32>
    %c4_41 = arith.constant 4 : index
    %c0_42 = arith.constant 0 : index
    %c0_43 = arith.constant 0 : index
    %43 = vector.load %arg4[%c4_41, %c0_42, %c0_43] : memref<8x32x32xf32, #tpu.memory_space<vmem>>, vector<1x32x32xf32>
    %44 = vector.shape_cast %43 : vector<1x32x32xf32> to vector<32x32xf32>
    %cst_44 = arith.constant dense<0.000000e+00> : vector<8x32xf32>
    %45 = tpu.matmul %4, %44, %cst_44 {dimension_numbers = #tpu.dot_dimension_numbers<[1], [0], [0], [1], [0, 0, 1, 1], [], []>} : vector<8x32xf32>, vector<32x32xf32>, vector<8x32xf32> -> vector<8x32xf32>
    %46 = arith.addf %42, %45 : vector<8x32xf32>
    %c4_45 = arith.constant 4 : index
    %c0_46 = arith.constant 0 : index
    %c0_47 = arith.constant 0 : index
    %47 = vector.load %arg7[%c4_45, %c0_46, %c0_47] : memref<8x8x32xf32, #tpu.memory_space<vmem>>, vector<1x8x32xf32>
    %48 = vector.shape_cast %47 : vector<1x8x32xf32> to vector<8x32xf32>
    %49 = vector.shape_cast %46 : vector<8x32xf32> to vector<1x8x32xf32>
    tpu.vector_store %arg7[%c4_45, %c0_46, %c0_47], %49 {strides = array<i32>} : memref<8x8x32xf32, #tpu.memory_space<vmem>>, vector<1x8x32xf32>,
    %c5 = arith.constant 5 : index
    %c0_48 = arith.constant 0 : index
    %c0_49 = arith.constant 0 : index
    %50 = vector.load %arg7[%c5, %c0_48, %c0_49] : memref<8x8x32xf32, #tpu.memory_space<vmem>>, vector<1x8x32xf32>
    %51 = vector.shape_cast %50 : vector<1x8x32xf32> to vector<8x32xf32>
    %c5_50 = arith.constant 5 : index
    %c0_51 = arith.constant 0 : index
    %c0_52 = arith.constant 0 : index
    %52 = vector.load %arg4[%c5_50, %c0_51, %c0_52] : memref<8x32x32xf32, #tpu.memory_space<vmem>>, vector<1x32x32xf32>
    %53 = vector.shape_cast %52 : vector<1x32x32xf32> to vector<32x32xf32>
    %cst_53 = arith.constant dense<0.000000e+00> : vector<8x32xf32>
    %54 = tpu.matmul %4, %53, %cst_53 {dimension_numbers = #tpu.dot_dimension_numbers<[1], [0], [0], [1], [0, 0, 1, 1], [], []>} : vector<8x32xf32>, vector<32x32xf32>, vector<8x32xf32> -> vector<8x32xf32>
    %55 = arith.addf %51, %54 : vector<8x32xf32>
    %c5_54 = arith.constant 5 : index
    %c0_55 = arith.constant 0 : index
    %c0_56 = arith.constant 0 : index
    %56 = vector.load %arg7[%c5_54, %c0_55, %c0_56] : memref<8x8x32xf32, #tpu.memory_space<vmem>>, vector<1x8x32xf32>
    %57 = vector.shape_cast %56 : vector<1x8x32xf32> to vector<8x32xf32>
    %58 = vector.shape_cast %55 : vector<8x32xf32> to vector<1x8x32xf32>
    tpu.vector_store %arg7[%c5_54, %c0_55, %c0_56], %58 {strides = array<i32>} : memref<8x8x32xf32, #tpu.memory_space<vmem>>, vector<1x8x32xf32>,
    %c6 = arith.constant 6 : index
    %c0_57 = arith.constant 0 : index
    %c0_58 = arith.constant 0 : index
    %59 = vector.load %arg7[%c6, %c0_57, %c0_58] : memref<8x8x32xf32, #tpu.memory_space<vmem>>, vector<1x8x32xf32>
    %60 = vector.shape_cast %59 : vector<1x8x32xf32> to vector<8x32xf32>
    %c6_59 = arith.constant 6 : index
    %c0_60 = arith.constant 0 : index
    %c0_61 = arith.constant 0 : index
    %61 = vector.load %arg4[%c6_59, %c0_60, %c0_61] : memref<8x32x32xf32, #tpu.memory_space<vmem>>, vector<1x32x32xf32>
    %62 = vector.shape_cast %61 : vector<1x32x32xf32> to vector<32x32xf32>
    %cst_62 = arith.constant dense<0.000000e+00> : vector<8x32xf32>
    %63 = tpu.matmul %4, %62, %cst_62 {dimension_numbers = #tpu.dot_dimension_numbers<[1], [0], [0], [1], [0, 0, 1, 1], [], []>} : vector<8x32xf32>, vector<32x32xf32>, vector<8x32xf32> -> vector<8x32xf32>
    %64 = arith.addf %60, %63 : vector<8x32xf32>
    %c6_63 = arith.constant 6 : index
    %c0_64 = arith.constant 0 : index
    %c0_65 = arith.constant 0 : index
    %65 = vector.load %arg7[%c6_63, %c0_64, %c0_65] : memref<8x8x32xf32, #tpu.memory_space<vmem>>, vector<1x8x32xf32>
    %66 = vector.shape_cast %65 : vector<1x8x32xf32> to vector<8x32xf32>
    %67 = vector.shape_cast %64 : vector<8x32xf32> to vector<1x8x32xf32>
    tpu.vector_store %arg7[%c6_63, %c0_64, %c0_65], %67 {strides = array<i32>} : memref<8x8x32xf32, #tpu.memory_space<vmem>>, vector<1x8x32xf32>,
    %c7 = arith.constant 7 : index
    %c0_66 = arith.constant 0 : index
    %c0_67 = arith.constant 0 : index
    %68 = vector.load %arg7[%c7, %c0_66, %c0_67] : memref<8x8x32xf32, #tpu.memory_space<vmem>>, vector<1x8x32xf32>
    %69 = vector.shape_cast %68 : vector<1x8x32xf32> to vector<8x32xf32>
    %c7_68 = arith.constant 7 : index
    %c0_69 = arith.constant 0 : index
    %c0_70 = arith.constant 0 : index
    %70 = vector.load %arg4[%c7_68, %c0_69, %c0_70] : memref<8x32x32xf32, #tpu.memory_space<vmem>>, vector<1x32x32xf32>
    %71 = vector.shape_cast %70 : vector<1x32x32xf32> to vector<32x32xf32>
    %cst_71 = arith.constant dense<0.000000e+00> : vector<8x32xf32>
    %72 = tpu.matmul %4, %71, %cst_71 {dimension_numbers = #tpu.dot_dimension_numbers<[1], [0], [0], [1], [0, 0, 1, 1], [], []>} : vector<8x32xf32>, vector<32x32xf32>, vector<8x32xf32> -> vector<8x32xf32>
    %73 = arith.addf %69, %72 : vector<8x32xf32>
    %c7_72 = arith.constant 7 : index
    %c0_73 = arith.constant 0 : index
    %c0_74 = arith.constant 0 : index
    %74 = vector.load %arg7[%c7_72, %c0_73, %c0_74] : memref<8x8x32xf32, #tpu.memory_space<vmem>>, vector<1x8x32xf32>
    %75 = vector.shape_cast %74 : vector<1x8x32xf32> to vector<8x32xf32>
    %76 = vector.shape_cast %73 : vector<8x32xf32> to vector<1x8x32xf32>
    tpu.vector_store %arg7[%c7_72, %c0_73, %c0_74], %76 {strides = array<i32>} : memref<8x8x32xf32, #tpu.memory_space<vmem>>, vector<1x8x32xf32>,
    %c0_i32_75 = arith.constant 0 : i32
    %77 = arith.cmpi eq, %arg2, %c0_i32_75 : i32
    %78 = arith.extui %77 : i1 to i32
    %c0_i32_76 = arith.constant 0 : i32
    %79 = arith.cmpi ne, %78, %c0_i32_76 : i32
    scf.if %79 {
      %c0_77 = arith.constant 0 : index
      %c0_78 = arith.constant 0 : index
      %c0_79 = arith.constant 0 : index
      %80 = vector.load %arg7[%c0_77, %c0_78, %c0_79] : memref<8x8x32xf32, #tpu.memory_space<vmem>>, vector<8x8x32xf32>
      %c0_80 = arith.constant 0 : index
      %c0_81 = arith.constant 0 : index
      %c0_82 = arith.constant 0 : index
      %81 = vector.load %arg5[%c0_80, %c0_81, %c0_82] : memref<8x1x32xf32, #tpu.memory_space<vmem>>, vector<8x1x32xf32>
      %82 = vector.broadcast %81 : vector<8x1x32xf32> to vector<8x8x32xf32>
      %83 = arith.addf %80, %82 : vector<8x8x32xf32>
      %c0_83 = arith.constant 0 : index
      %c0_84 = arith.constant 0 : index
      %c0_85 = arith.constant 0 : index
      %c0_86 = arith.constant 0 : index
      %84 = vector.load %arg6[%c0_83, %c0_84, %c0_85, %c0_86] : memref<1x8x8x32xf32, #tpu.memory_space<vmem>>, vector<1x8x8x32xf32>
      %85 = vector.shape_cast %84 : vector<1x8x8x32xf32> to vector<8x8x32xf32>
      %86 = vector.shape_cast %83 : vector<8x8x32xf32> to vector<1x8x8x32xf32>
      tpu.vector_store %arg6[%c0_83, %c0_84, %c0_85, %c0_86], %86 {strides = array<i32>} : memref<1x8x8x32xf32, #tpu.memory_space<vmem>>, vector<1x8x8x32xf32>,
    } else {
    }
    return
  }
  func.func @transform_0(%arg0: i32, %arg1: i32, %arg2: i32) -> (i32, i32, i32) {
    %c0_i32 = arith.constant 0 : i32
    return %arg0, %arg1, %arg2 : i32, i32, i32
  }
  func.func @transform_1(%arg0: i32, %arg1: i32, %arg2: i32) -> (i32, i32, i32) {
    %c0_i32 = arith.constant 0 : i32
    %c0_i32_0 = arith.constant 0 : i32
    %c0_i32_1 = arith.constant 0 : i32
    return %c0_i32, %arg2, %c0_i32_0 : i32, i32, i32
  }
  func.func @transform_2(%arg0: i32, %arg1: i32, %arg2: i32) -> (i32, i32, i32) {
    %c0_i32 = arith.constant 0 : i32
    %c0_i32_0 = arith.constant 0 : i32
    %c0_i32_1 = arith.constant 0 : i32
    %c0_i32_2 = arith.constant 0 : i32
    return %c0_i32, %c0_i32_0, %c0_i32_1 : i32, i32, i32
  }
  func.func @transform_3(%arg0: i32, %arg1: i32, %arg2: i32) -> (i32, i32, i32, i32) {
    %c0_i32 = arith.constant 0 : i32
    %c0_i32_0 = arith.constant 0 : i32
    %c0_i32_1 = arith.constant 0 : i32
    return %arg0, %c0_i32, %arg1, %c0_i32_0 : i32, i32, i32, i32
  }
}

</mosaic_0001>

<bundles_post_ra>
// kernel: tpu_custom_call.1
= control target key start
LH: loop header
LB: loop body
LE: loop exit
PB: predicated region body
PF: predicated region fallthrough
CT: control target
= control target key end

     0   :  { %8 = vsyncpa [#allocation4], 0  ;;  %s1965_s0 = inlined_call_operand.hbm [shape: f32[2,8,32], index: 0, kind: input, shape index: {}]   ;;  %s1966_s1 = inlined_call_operand.hbm [shape: f32[8,32,32], index: 1, kind: input, shape index: {}]   ;;  %s1967_s2 = inlined_call_operand.hbm [shape: f32[8,1,32], index: 2, kind: input, shape index: {}]   ;;  %s1968_s3 = inlined_call_operand.hbm [shape: f32[2,8,8,32], index: 3, kind: output, shape index: {}]  }
   0x1   :  { %10 = vsyncpa [#allocation4 + $0x1], 0 }
   0x2   :  { %11 = vsyncpa [#allocation7], 0 }
   0x3   :  { %12 = vsyncpa [#allocation5], 0 }
   0x4   :  { %14 = vsyncpa [#allocation5 + $0x1], 0  ;;  %s1616_s12 = smov 0   ;;  %s1618_s13 = smov 0  }
   0x5   :  { %s1620_s14 = smov 0   ;;  %s1622_s15 = smov 0  }
   0x6   :  { %s1624_s16 = smov 0   ;;  %s1626_s17 = smov 0  }
   0x7 LB: > { %s1106_s18 = sadd.s32 4294967295, %s1581_s17   ;;  %s1107_s19 = sadd.s32 4294967294, %s1581_s17   ;;  %s1581_s17 = sphi %s1626_s17, %s20_s17   ;;  %s1577_s16 = sphi %s1624_s16, %s1990_s16   ;;  %s1573_s15 = sphi %s1622_s15, %s1989_s15   ;;  %s1569_s14 = sphi %s1620_s14, %s1988_s14   ;;  %s1565_s13 = sphi %s1618_s13, %s1987_s13   ;;  %s1561_s12 = sphi %s1616_s12, %s1986_s12  }
   0x8   : > { %p63_p0 = scmp.ne.s32.totalorder %s1565_s13, %s1561_s12  ;;  %p1650_p1 = scmp.eq.s32.totalorder %s1106_s18, 0 }
   0x9   : > { %p1654_p2 = scmp.eq.s32.totalorder %s1106_s18, 1  ;;  %p142_p3 = scmp.eq.s32.totalorder %s1107_s19, 1 }
   0xa   : > { %s1973_s20 = scalar_select %p1650_p1, 1, 0 }
   0xb   : > { %p1660_p4 = por %p1650_p1, %p63_p0  ;;  %p1108_p5 = scmp.ge.s32.totalorder %s1581_s17, 1 }
   0xc   : > { %p1665_p6 = por %p142_p3, %p63_p0  ;;  %p149_p7 = scmp.lt.s32.totalorder %s1581_s17, 3 }
   0xd   : > { %s1975_s22 = scalar_select %p1660_p4, 1, 0 }
   0xe   : > { %s1976_s23 = scalar_select %p1665_p6, 1, 0 }
   0xf   : > { %p1670_p8 = pnand %p1108_p5, %p149_p7  ;;  %s1583_s25 = smov [#allocation6]  }
  0x10   : > { %s164_s26 = sshll.u32 %s1583_s25, 4  ;;  %s1584_s28 = smov [#allocation8]   ;;  %s1674_s26 = int_to_ptr.vmem [resolvable:$true] %s164_s26 }
  0x11   : > { %p1329_p9 = pneg %p1670_p8  ;;  %s177_s29 = sshll.u32 %s1584_s28, 4  ;;  %s1685_s29 = int_to_ptr.vmem [resolvable:$true] %s177_s29 }
  0x12   : > { %s1409_s5 = scalar_lea.hbm %s1966_s1, 4096 }
  0x13   : > { %p1681_p11 = pnand %p1329_p9, %p1650_p1  ;;  %p1410_p12 = scmp.ne.s32.totalorder %s1966_s1, %s1409_s5 }
  0x14   : > { %p1416_p5 = scmp.lt.u32.totalorder %s1409_s5, %s1966_s1 }
  0x15   : > { %p1411_p13 = pneg %p1681_p11 }
  0x17   : > { %p1412_p0 = pnand %p1411_p13, %p1410_p12 }
  0x19   : > { %p1413_p3 = pneg %p1412_p0 }
  0x1b   : > { %p1418_p7 = pnand %p1416_p5, %p1413_p3 }
  0x1d   : > { %1421 = shalt.err (!%p1418_p7)
}
  0x1e   : > { %s1422_s10 = scalar_lea.vmem %s1674_s26, 4096  ;;  %p1430_p1 = scmp.lt.s32.totalorder %s1674_s26, %s1674_s26 }
  0x1f   : > { %p1423_p9 = scmp.ne.s32.totalorder %s1674_s26, %s1422_s10  ;;  %p1431_p12 = scmp.lt.s32.totalorder %s1422_s10, %s1422_s10 }
  0x21   : > { %p1425_p10 = pnand %p1423_p9, %p1411_p13  ;;  %p1432_p0 = por %p1431_p12, %p1430_p1 }
  0x23   : > { %p1426_p6 = pneg %p1425_p10 }
  0x25   : > { %p1433_p4 = pnand %p1432_p0, %p1426_p6 }
  0x27   : > { %1436 = shalt.err (!%p1433_p4)
}
  0x28   : > { %s1585_s11 = smov 128   ;;  %s1586_s18 = smov 8  }
  0x29   : > { %1332 = dma.hbm_to_vmem [thread:$0]  (!%p1681_p11), %s1966_s1, 4096, %s1674_s26, [#allocation7], %s1585_s11, %s1585_s11, %s1586_s18  }
  0x2a   : > { %s1437_s4 = scalar_lea.hbm %s1967_s2, 128 }
  0x2b   : > { %p1438_p1 = scmp.ne.s32.totalorder %s1967_s2, %s1437_s4  ;;  %p1444_p10 = scmp.lt.u32.totalorder %s1437_s4, %s1967_s2 }
  0x2d   : > { %p1440_p4 = pnand %p1438_p1, %p1411_p13 }
  0x2f   : > { %p1441_p6 = pneg %p1440_p4 }
  0x31   : > { %p1446_p3 = pnand %p1444_p10, %p1441_p6 }
  0x33   : > { %1449 = shalt.err (!%p1446_p3)
}
  0x34   : > { %s1450_s26 = scalar_lea.vmem %s1685_s29, 128  ;;  %p1458_p12 = scmp.lt.s32.totalorder %s1685_s29, %s1685_s29 }
  0x35   : > { %p1451_p5 = scmp.ne.s32.totalorder %s1685_s29, %s1450_s26  ;;  %p1459_p0 = scmp.lt.s32.totalorder %s1450_s26, %s1450_s26 }
  0x37   : > { %p1453_p7 = pnand %p1451_p5, %p1411_p13  ;;  %p1460_p1 = por %p1459_p0, %p1458_p12 }
  0x39   : > { %p1454_p9 = pneg %p1453_p7 }
  0x3b   : > { %p1461_p4 = pnand %p1460_p1, %p1454_p9 }
  0x3d   : > { %1464 = shalt.err (!%p1461_p4)
}
  0x3e   : > { %s1587_s9 = smov 16   ;;  %s1588_s10 = smov 1  }
  0x3f   : > { %1335 = dma.hbm_to_vmem [thread:$0]  (!%p1681_p11), %s1967_s2, 128, %s1685_s29, [#allocation7], %s1587_s9, %s1587_s9, %s1588_s10  }
  0x40   : > { %s39_s19 = sadd.s32 1, %s1577_s16  ;;  %s50_s25 = sadd.s32 1, %s1569_s14 }
  0x41   : > { %p41_p13 = scmp.ge.s32.totalorder %s39_s19, 2  ;;  %p57_p6 = scmp.ne.s32.totalorder %s1569_s14, %s1565_s13 }
  0x42   : > { %p58_p10 = scmp.eq.s32.totalorder %s1581_s17, 0  ;;  %p1346_p3 = scmp.lt.s32.totalorder %s1581_s17, 2 }
  0x43   : > { %s1992_s19 = smov (%p41_p13, %s39_s19), 0  ;;  %p1749_p7 = por %p1654_p2, %p57_p6 }
  0x44   : > { %p59_p5 = por %p58_p10, %p57_p6  ;;  %s43_s27 = ssub.s32 %s1577_s16, %s1992_s19 }
  0x45   : > { %s1979_s28 = scalar_select %p1749_p7, 1, 0 }
  0x46   : > { %s191_s30 = sand.u32 1, %s1569_s14   ;;  %p48_p9 = scmp.eq.s32.totalorder %s43_s27, 0 }
  0x47   : > { %s1112_s29 = sshll.u32 %s191_s30, 3  ;;  %s1113_s4 = sshll.u32 %s1577_s16, 7 }
  0x48   : > { %s1758_s5 = scalar_select %p48_p9, %s1569_s14, %s50_s25  }
  0x49   : > { %s1763_s8 = scalar_lea.hbm %s1965_s0, %s1113_s4  ;;  %s195_s21 = scalar_lea.vmem [#allocation3], %s1112_s29 }
  0x4a   : > { %s204_s26 = sshll.u32 %s195_s21, 4  ;;  %p1767_p2 = pnand %p1346_p3, %p59_p5  ;;  %s1771_s26 = int_to_ptr.vmem [resolvable:$true] %s204_s26 }
  0x4b   : > { %s192_s10 = scalar_lea.sflag [#allocation4], %s191_s30  ;;  %s1465_s11 = scalar_lea.hbm %s1763_s8, 128 }
  0x4c   : > { %p1466_p11 = scmp.ne.s32.totalorder %s1763_s8, %s1465_s11  ;;  %p1467_p12 = pneg %p1767_p2 }
  0x4d   : > { %s1470_s27 = scalar_lea.hbm %s1965_s0, 256  ;;  %p1471_p4 = scmp.lt.u32.totalorder %s1763_s8, %s1965_s0 }
  0x4e   : > { %p1468_p0 = pnand %p1467_p12, %p1466_p11  ;;  %p1472_p13 = scmp.lt.u32.totalorder %s1470_s27, %s1465_s11 }
  0x4f   : > { %p1474_p10 = scmp.lt.u32.totalorder %s1465_s11, %s1763_s8 }
  0x50   : > { %p1469_p1 = pneg %p1468_p0  ;;  %p1473_p6 = por %p1472_p13, %p1471_p4 }
  0x52   : > { %p1475_p3 = por %p1474_p10, %p1473_p6 }
  0x54   : > { %p1476_p5 = pnand %p1475_p3, %p1469_p1 }
  0x56   : > { %1479 = shalt.err (!%p1476_p5)
}
  0x57   : > { %s1480_s30 = scalar_lea.vmem %s1771_s26, 128  ;;  %s1589_s6 = smov [#allocation3]  }
  0x58   : > { %p1481_p9 = scmp.ne.s32.totalorder %s1771_s26, %s1480_s30  ;;  %s1485_s7 = sshll.u32 %s1589_s6, 4  ;;  %s1486_s7 = int_to_ptr.vmem [resolvable:$false] %s1485_s7 }
  0x59   : > { %s1487_s21 = scalar_lea.vmem %s1486_s7, 256  ;;  %p1488_p7 = scmp.lt.s32.totalorder %s1771_s26, %s1486_s7 }
  0x5a   : > { %p1483_p11 = pnand %p1481_p9, %p1467_p12  ;;  %p1489_p4 = scmp.lt.s32.totalorder %s1487_s21, %s1480_s30 }
  0x5c   : > { %p1484_p0 = pneg %p1483_p11  ;;  %p1490_p13 = por %p1489_p4, %p1488_p7 }
  0x5e   : > { %p1491_p6 = pnand %p1490_p13, %p1484_p0 }
  0x60   : > { %1494 = shalt.err (!%p1491_p6)
}
  0x61   : > { %1339 = dma.hbm_to_vmem [thread:$0]  (!%p1767_p2), %s1763_s8, 128, %s1771_s26, %s192_s10  }
  0x62   : > { %213 = sbr.rel (%p1670_p8) target bundleno = 384 (0x180), region = 32  ;;  %s1801_s11 = sand.u32 (!%p1670_p8), 1, %s1565_s13  }
  0x63   : > { %s1115_s18 = sshll.u32 (!%p1670_p8), %s1801_s11, 3  ;;  %s216_s25 = scalar_lea.sflag (!%p1670_p8), [#allocation4], %s1801_s11 }
  0x64   : > { %s1805_s27 = scalar_lea.vmem (!%p1670_p8), [#allocation3], %s1115_s18  ;;  %p1981_p7 = scmp.ne.s32.totalorder (!%p1670_p8), %s1975_s22, 0 }
  0x69   : > { %1548 = dma.done.wait (%p1981_p7), %s216_s25, 128  }
  0x6a   : > { %1550 = vsyncadd (%p1981_p7), %s216_s25, 4294967168  ;;  %p1982_p2 = scmp.ne.s32.totalorder %s1973_s20, 0 }
  0x6c   : > { %1552 = dma.done.wait (%p1982_p2), [#allocation7], 4224  }
  0x6d   : > { %1554 = vsyncadd (%p1982_p2), [#allocation7], 4294963072  ;;  %vm255_vm0 = vcmask 261120   ;;  %v1590_v0 = vmov 0.0|0.0   ;;  %v1591_v1 = vmov 0.0   ;;  %vm1592_vm1 = vmmov 0  }
  0x6e   : > { %1269 = vmatprep.subr.bf16.mxu0 %v1590_v0  ;;  %1275 = vmatprep.subr.bf16.mxu1 %v1590_v0  ;;  %256 = vst.msk [vmem:[#allocation2] sm:$0xff] %vm255_vm0, %v1591_v1  ;;  %257 = vst.msk [vmem:[#allocation2 + $0x8] sm:$0xff] %vm255_vm0, %v1591_v1  ;;  %v266_v2 = vld [vmem:[#allocation6] sm:$0xff]  ;;  %v267_v3 = vld [vmem:[#allocation6 + $0x8] sm:$0xff]  ;;  %s1118_s20 = sshll.u32 %s1801_s11, 6  ;;  %s1140_s24 = sshll.u32 %s1573_s15, 10 }
  0x6f   : > { %258 = vst.msk [vmem:[#allocation2 + $0x10] sm:$0xff] %vm255_vm0, %v1591_v1  ;;  %259 = vst.msk [vmem:[#allocation2 + $0x18] sm:$0xff] %vm255_vm0, %v1591_v1  ;;  %1189 = vmatprep.mubr.msk.f32.mxu0 %vm1592_vm1, %v1591_v1  ;;  %1200 = vmatprep.mubr.msk.f32.mxu1 %vm1592_vm1, %v1591_v1  ;;  %v349_v4 = vld [vmem:[#allocation6 + $0x20] sm:$0xff]  ;;  %v1270_v5 = vpack.c.bf16 %v267_v3, %v266_v2  ;;  %v350_v6 = vld [vmem:[#allocation6 + $0x28] sm:$0xff]  ;;  %s1887_s22 = scalar_lea.vmem [#allocation9], %s1118_s20  ;;  %s1910_s10 = scalar_lea.hbm %s1968_s3, %s1140_s24 }
  0x70   : > { %260 = vst.msk [vmem:[#allocation2 + $0x20] sm:$0xff] %vm255_vm0, %v1591_v1  ;;  %261 = vst.msk [vmem:[#allocation2 + $0x28] sm:$0xff] %vm255_vm0, %v1591_v1  ;;  %v268_v7 = vld [vmem:[#allocation6 + $0x10] sm:$0xff]  ;;  %v269_v8 = vld [vmem:[#allocation6 + $0x18] sm:$0xff]  ;;  %v1276_v9 = vpack.c.bf16 %v350_v6, %v349_v4  ;;  %s997_s8 = sshll.u32 %s1887_s22, 4  ;;  %s983_s15 = scalar_lea.sflag [#allocation5], %s1801_s11  ;;  %s1912_s8 = int_to_ptr.vmem [resolvable:$true] %s997_s8 }
  0x71   : > { %262 = vst.msk [vmem:[#allocation2 + $0x30] sm:$0xff] %vm255_vm0, %v1591_v1  ;;  %263 = vst.msk [vmem:[#allocation2 + $0x38] sm:$0xff] %vm255_vm0, %v1591_v1  ;;  %v351_v10 = vld [vmem:[#allocation6 + $0x30] sm:$0xff]  ;;  %v352_v11 = vld [vmem:[#allocation6 + $0x38] sm:$0xff]  ;;  %1271 = vmatpush3.bf16.msra.mxu0 %v1270_v5  ;;  %v1273_v12 = vpack.c.bf16 %v269_v8, %v268_v7  ;;  %s1495_s29 = scalar_lea.vmem %s1912_s8, 1024  ;;  %p1983_p12 = scmp.ne.s32.totalorder %s1979_s28, 0 }
  0x72   : > { %1277 = vmatpush3.bf16.msra.mxu1 %v1276_v9  ;;  %1272 = vmatprep.subr.bf16.mxu0 %v1590_v0  ;;  %v1279_v13 = vpack.c.bf16 %v352_v11, %v351_v10  ;;  %v428_v14 = vld [vmem:[#allocation6 + $0x40] sm:$0xff]  ;;  %v429_v15 = vld [vmem:[#allocation6 + $0x48] sm:$0xff]  ;;  %v1840_v18 = vld [vmem:[%s1805_s27] sm:$0xff]  ;;  %p1496_p8 = scmp.ne.s32.totalorder %s1912_s8, %s1495_s29  ;;  %s1593_s4 = smov [#allocation9]  }
  0x73   : > { %1278 = vmatprep.subr.bf16.mxu1 %v1590_v0  ;;  %v507_v16 = vld [vmem:[#allocation6 + $0x60] sm:$0xff]  ;;  %v508_v17 = vld [vmem:[#allocation6 + $0x68] sm:$0xff]  ;;  %v1282_v19 = vpack.c.bf16 %v429_v15, %v428_v14  ;;  %v430_v21 = vld [vmem:[#allocation6 + $0x50] sm:$0xff]  ;;  %s1499_s30 = sshll.u32 %s1593_s4, 4  ;;  %s1500_s30 = int_to_ptr.vmem [resolvable:$false] %s1499_s30 }
  0x74   : > { %v1288_v20 = vpack.c.bf16 %v508_v17, %v507_v16  ;;  %v431_v22 = vld [vmem:[#allocation6 + $0x58] sm:$0xff]  ;;  %v509_v23 = vld [vmem:[#allocation6 + $0x70] sm:$0xff]  ;;  %v586_v27 = vld [vmem:[#allocation6 + $0x80] sm:$0xff]  ;;  %p1497_p1 = pnand %p1496_p8, %p1983_p12  ;;  %s1501_s6 = scalar_lea.vmem %s1500_s30, 2048 }
  0x75   : > { %1274 = vmatpush3.bf16.msra.mxu0 %v1273_v12  ;;  %v510_v24 = vld [vmem:[#allocation6 + $0x78] sm:$0xff]  ;;  %v1285_v25 = vpack.c.bf16 %v431_v22, %v430_v21  ;;  %v587_v28 = vld [vmem:[#allocation6 + $0x88] sm:$0xff]  ;;  %v665_v29 = vld [vmem:[#allocation6 + $0xa0] sm:$0xff]  ;;  %p1502_p3 = scmp.lt.s32.totalorder %s1912_s8, %s1500_s30  ;;  %p1503_p5 = scmp.lt.s32.totalorder %s1501_s6, %s1495_s29 }
  0x76   : > { %1280 = vmatpush3.bf16.msra.mxu1 %v1279_v13  ;;  %1281 = vmatprep.subr.bf16.mxu0 %v1590_v0  ;;  %v1291_v26 = vpack.c.bf16 %v510_v24, %v509_v23  ;;  %v666_v30 = vld [vmem:[#allocation6 + $0xa8] sm:$0xff]  ;;  %v1294_v31 = vpack.c.bf16 %v587_v28, %v586_v27  ;;  %v588_v33 = vld [vmem:[#allocation6 + $0x90] sm:$0xff]  ;;  %v589_v34 = vld [vmem:[#allocation6 + $0x98] sm:$0xff]  ;;  %p1498_p10 = pneg %p1497_p1 }
  0x77   : > { %1287 = vmatprep.subr.bf16.mxu1 %v1590_v0  ;;  %v1300_v32 = vpack.c.bf16 %v666_v30, %v665_v29  ;;  %v667_v35 = vld [vmem:[#allocation6 + $0xb0] sm:$0xff]  ;;  %v668_v36 = vld [vmem:[#allocation6 + $0xb8] sm:$0xff]  ;;  %v1297_v37 = vpack.c.bf16 %v589_v34, %v588_v33  ;;  %v744_v39 = vld [vmem:[#allocation6 + $0xc0] sm:$0xff]  ;;  %p1504_p9 = por %p1503_p5, %p1502_p3 }
  0x78   : > { %1190 = vmatmul.mubr.msk.f32.vlgmr.msra.gmra.mrb[0].mxu0 %vm255_vm0, %v1840_v18  ;;  %v1303_v38 = vpack.c.bf16 %v668_v36, %v667_v35  ;;  %v745_v40 = vld [vmem:[#allocation6 + $0xc8] sm:$0xff]  ;;  %v823_v41 = vld [vmem:[#allocation6 + $0xe0] sm:$0xff]  ;;  %v746_v45 = vld [vmem:[#allocation6 + $0xd0] sm:$0xff] }
  0x79   : > { %1201 = vmatmul.mubr.msk.f32.vlgmr.msra.gmra.mrb[0].mxu1 %vm255_vm0, %v1840_v18  ;;  %1283 = vmatpush3.bf16.msra.mxu0 %v1282_v19  ;;  %v824_v42 = vld [vmem:[#allocation6 + $0xe8] sm:$0xff]  ;;  %v1306_v43 = vpack.c.bf16 %v745_v40, %v744_v39  ;;  %v747_v46 = vld [vmem:[#allocation6 + $0xd8] sm:$0xff]  ;;  %v825_v47 = vld [vmem:[#allocation6 + $0xf0] sm:$0xff]  ;;  %p1505_p11 = pnand %p1504_p9, %p1498_p10 }
  0x7a   : > { %1289 = vmatpush3.bf16.msra.mxu1 %v1288_v20  ;;  %1284 = vmatprep.subr.bf16.mxu0 %v1590_v0  ;;  %v1312_v44 = vpack.c.bf16 %v824_v42, %v823_v41  ;;  %v826_v48 = vld [vmem:[#allocation6 + $0xf8] sm:$0xff]  ;;  %v1309_v49 = vpack.c.bf16 %v747_v46, %v746_v45  ;;  %v265_v51 = vld [vmem:[#allocation2] sm:$0xff]  ;;  %v426_v59 = vld [vmem:[#allocation2 + $0x10] sm:$0xff] }
  0x7b   : > { %1290 = vmatprep.subr.bf16.mxu1 %v1590_v0  ;;  %1211 = vmatprep.mubr.msk.f32.mxu0 %vm1592_vm1, %v1591_v1  ;;  %v1315_v50 = vpack.c.bf16 %v826_v48, %v825_v47  ;;  %v347_v52 = vld [vmem:[#allocation2 + $0x8] sm:$0xff]  ;;  %v505_v60 = vld [vmem:[#allocation2 + $0x18] sm:$0xff]  ;;  %v1127_v61 = vld [vmem:[#allocation8] ss:$0 sm:$0xff] }
  0x7c   : > { %1222 = vmatprep.mubr.msk.f32.mxu1 %vm1592_vm1, %v1591_v1  ;;  %v1128_v63 = vld [vmem:[#allocation8 + $0x1] ss:$0 sm:$0xff]  ;;  %v584_v9 = vld [vmem:[#allocation2 + $0x20] sm:$0xff]  ;;  %v663_v10 = vld [vmem:[#allocation2 + $0x28] sm:$0xff] }
  0x7d   : > { %1286 = vmatpush3.bf16.msra.mxu0 %v1285_v25  ;;  %v1129_v11 = vld [vmem:[#allocation8 + $0x2] ss:$0 sm:$0xff]  ;;  %v1130_v13 = vld [vmem:[#allocation8 + $0x3] ss:$0 sm:$0xff]  ;;  %v821_v24 = vld [vmem:[#allocation2 + $0x38] sm:$0xff] }
  0x7e   : > { %1292 = vmatpush3.bf16.msra.mxu1 %v1291_v26  ;;  %1293 = vmatprep.subr.bf16.mxu0 %v1590_v0  ;;  %v742_v23 = vld [vmem:[#allocation2 + $0x30] sm:$0xff] }
  0x7f   : > { %1299 = vmatprep.subr.bf16.mxu1 %v1590_v0  ;;  %v1131_v25 = vld [vmem:[#allocation8 + $0x4] ss:$0 sm:$0xff]  ;;  %v1132_v27 = vld [vmem:[#allocation8 + $0x5] ss:$0 sm:$0xff] }
  0x80   : > { %1212 = vmatmul.mubr.msk.f32.vlgmr.msra.gmra.mrb[2].mxu0 %vm255_vm0, %v1840_v18 }
  0x81   : > { %1223 = vmatmul.mubr.msk.f32.vlgmr.msra.gmra.mrb[2].mxu1 %vm255_vm0, %v1840_v18  ;;  %1295 = vmatpush3.bf16.msra.mxu0 %v1294_v31 }
  0x82   : > { %1301 = vmatpush3.bf16.msra.mxu1 %v1300_v32  ;;  %1296 = vmatprep.subr.bf16.mxu0 %v1590_v0 }
  0x83   : > { %1302 = vmatprep.subr.bf16.mxu1 %v1590_v0  ;;  %1233 = vmatprep.mubr.msk.f32.mxu0 %vm1592_vm1, %v1591_v1 }
  0x84   : > { %1244 = vmatprep.mubr.msk.f32.mxu1 %vm1592_vm1, %v1591_v1 }
  0x85   : > { %1298 = vmatpush3.bf16.msra.mxu0 %v1297_v37  ;;  %v1133_v37 = vld [vmem:[#allocation8 + $0x6] ss:$0 sm:$0xff] }
  0x86   : > { %1304 = vmatpush3.bf16.msra.mxu1 %v1303_v38  ;;  %1305 = vmatprep.subr.bf16.mxu0 %v1590_v0  ;;  %v1134_v38 = vld [vmem:[#allocation8 + $0x7] ss:$0 sm:$0xff] }
  0x87   : > { %1311 = vmatprep.subr.bf16.mxu1 %v1590_v0 }
  0x88   : > { %1234 = vmatmul.mubr.msk.f32.vlgmr.msra.gmra.mrb[4].mxu0 %vm255_vm0, %v1840_v18 }
  0x89   : > { %1245 = vmatmul.mubr.msk.f32.vlgmr.msra.gmra.mrb[4].mxu1 %vm255_vm0, %v1840_v18  ;;  %1307 = vmatpush3.bf16.msra.mxu0 %v1306_v43 }
  0x8a   : > { %1313 = vmatpush3.bf16.msra.mxu1 %v1312_v44  ;;  %1308 = vmatprep.subr.bf16.mxu0 %v1590_v0 }
  0x8b   : > { %1314 = vmatprep.subr.bf16.mxu1 %v1590_v0  ;;  %1255 = vmatprep.mubr.msk.f32.mxu0 %vm1592_vm1, %v1591_v1 }
  0x8c   : > { %1266 = vmatprep.mubr.msk.f32.mxu1 %vm1592_vm1, %v1591_v1 }
  0x8d   : > { %1310 = vmatpush3.bf16.msra.mxu0 %v1309_v49 }
  0x8e   : > { %1316 = vmatpush3.bf16.msra.mxu1 %v1315_v50 }
  0x90   : > { %1256 = vmatmul.mubr.msk.f32.vlgmr.msra.gmra.mrb[6].mxu0 %vm255_vm0, %v1840_v18 }
  0x91   : > { %1267 = vmatmul.mubr.msk.f32.vlgmr.msra.gmra.mrb[6].mxu1 %vm255_vm0, %v1840_v18 }
 0x14b   : > { %v340_v53 = vpop.f32.mrb[0].mxu0 }
 0x14c   : > { %v344_v54 = vadd.f32 %v340_v53, %v265_v51  ;;  %v419_v55 = vpop.f32.mrb[0].mxu1  ;;  %v1191_v56 = vpop.f32.mrb[1].mxu0 }
 0x14d   : > { %v423_v57 = vadd.f32 %v419_v55, %v347_v52  ;;  %v1202_v58 = vpop.f32.mrb[1].mxu1 }
 0x14e   : > { %345 = vst.msk [vmem:[#allocation2] sm:$0xff] %vm255_vm0, %v344_v54 }
 0x14f   : > { %424 = vst.msk [vmem:[#allocation2 + $0x8] sm:$0xff] %vm255_vm0, %v423_v57 }
 0x153   : > { %v498_v62 = vpop.f32.mrb[2].mxu0 }
 0x154   : > { %v502_v0 = vadd.f32 %v498_v62, %v426_v59  ;;  %v577_v1 = vpop.f32.mrb[2].mxu1  ;;  %v1213_v2 = vpop.f32.mrb[3].mxu0 }
 0x155   : > { %v902_v3 = vld [vmem:[#allocation2] sm:$0xff]  ;;  %v581_v4 = vadd.f32 %v577_v1, %v505_v60  ;;  %v1224_v5 = vpop.f32.mrb[3].mxu1 }
 0x156   : > { %v966_v6 = vadd.f32 %v1127_v61, %v902_v3  ;;  %v903_v7 = vld [vmem:[#allocation2 + $0x8] sm:$0xff]  ;;  %503 = vst.msk [vmem:[#allocation2 + $0x10] sm:$0xff] %vm255_vm0, %v502_v0 }
 0x157   : > { %v967_v8 = vadd.f32 %v1128_v63, %v903_v7  ;;  %582 = vst.msk [vmem:[#allocation2 + $0x18] sm:$0xff] %vm255_vm0, %v581_v4 }
 0x158   : > { %974 = vst.msk [vmem:[%s1887_s22] sm:$0xff] %vm255_vm0, %v966_v6 }
 0x159   : > { %975 = vst.msk [vmem:[%s1887_s22 + $0x8] sm:$0xff] %vm255_vm0, %v967_v8 }
 0x15b   : > { %v656_v12 = vpop.f32.mrb[4].mxu0 }
 0x15c   : > { %v660_v14 = vadd.f32 %v656_v12, %v584_v9  ;;  %v735_v15 = vpop.f32.mrb[4].mxu1  ;;  %v1235_v16 = vpop.f32.mrb[5].mxu0 }
 0x15d   : > { %v904_v17 = vld [vmem:[#allocation2 + $0x10] sm:$0xff]  ;;  %v739_v18 = vadd.f32 %v735_v15, %v663_v10  ;;  %v1246_v19 = vpop.f32.mrb[5].mxu1 }
 0x15e   : > { %v968_v20 = vadd.f32 %v1129_v11, %v904_v17  ;;  %v905_v21 = vld [vmem:[#allocation2 + $0x18] sm:$0xff]  ;;  %661 = vst.msk [vmem:[#allocation2 + $0x20] sm:$0xff] %vm255_vm0, %v660_v14 }
 0x15f   : > { %v969_v22 = vadd.f32 %v1130_v13, %v905_v21  ;;  %740 = vst.msk [vmem:[#allocation2 + $0x28] sm:$0xff] %vm255_vm0, %v739_v18 }
 0x160   : > { %976 = vst.msk [vmem:[%s1887_s22 + $0x10] sm:$0xff] %vm255_vm0, %v968_v20 }
 0x161   : > { %977 = vst.msk [vmem:[%s1887_s22 + $0x18] sm:$0xff] %vm255_vm0, %v969_v22 }
 0x163   : > { %v814_v26 = vpop.f32.mrb[6].mxu0 }
 0x164   : > { %v818_v28 = vadd.f32 %v814_v26, %v742_v23  ;;  %v893_v29 = vpop.f32.mrb[6].mxu1  ;;  %v1257_v30 = vpop.f32.mrb[7].mxu0 }
 0x165   : > { %v906_v31 = vld [vmem:[#allocation2 + $0x20] sm:$0xff]  ;;  %v897_v32 = vadd.f32 %v893_v29, %v821_v24  ;;  %v1268_v33 = vpop.f32.mrb[7].mxu1 }
 0x166   : > { %v970_v34 = vadd.f32 %v1131_v25, %v906_v31  ;;  %v907_v35 = vld [vmem:[#allocation2 + $0x28] sm:$0xff]  ;;  %819 = vst.msk [vmem:[#allocation2 + $0x30] sm:$0xff] %vm255_vm0, %v818_v28 }
 0x167   : > { %v971_v36 = vadd.f32 %v1132_v27, %v907_v35  ;;  %898 = vst.msk [vmem:[#allocation2 + $0x38] sm:$0xff] %vm255_vm0, %v897_v32 }
 0x168   : > { %978 = vst.msk [vmem:[%s1887_s22 + $0x20] sm:$0xff] %vm255_vm0, %v970_v34 }
 0x169   : > { %979 = vst.msk [vmem:[%s1887_s22 + $0x28] sm:$0xff] %vm255_vm0, %v971_v36 }
 0x16d   : > { %v908_v39 = vld [vmem:[#allocation2 + $0x30] sm:$0xff] }
 0x16e   : > { %v972_v40 = vadd.f32 %v1133_v37, %v908_v39  ;;  %v909_v41 = vld [vmem:[#allocation2 + $0x38] sm:$0xff] }
 0x16f   : > { %v973_v42 = vadd.f32 %v1134_v38, %v909_v41 }
 0x170   : > { %980 = vst.msk [vmem:[%s1887_s22 + $0x30] sm:$0xff] %vm255_vm0, %v972_v40 }
 0x171   : > { %981 = vst.msk [vmem:[%s1887_s22 + $0x38] sm:$0xff] %vm255_vm0, %v973_v42 }
 0x172   : > { %1508 = shalt.err (!%p1505_p11)
}
 0x173   : > { %s1509_s7 = scalar_lea.hbm %s1910_s10, 1024  ;;  %s1513_s25 = scalar_lea.hbm %s1968_s3, 2048 }
 0x174   : > { %p1510_p0 = scmp.ne.s32.totalorder %s1910_s10, %s1509_s7  ;;  %p1514_p6 = scmp.lt.u32.totalorder %s1910_s10, %s1968_s3 }
 0x175   : > { %p1515_p7 = scmp.lt.u32.totalorder %s1513_s25, %s1509_s7  ;;  %p1517_p8 = scmp.lt.u32.totalorder %s1509_s7, %s1910_s10 }
 0x176   : > { %p1511_p4 = pnand %p1510_p0, %p1983_p12 }
 0x177   : > { %p1516_p2 = por %p1515_p7, %p1514_p6 }
 0x178   : > { %p1512_p13 = pneg %p1511_p4 }
 0x179   : > { %p1518_p1 = por %p1517_p8, %p1516_p2 }
 0x17b   : > { %p1519_p10 = pnand %p1518_p1, %p1512_p13 }
 0x17d   : > { %1522 = shalt.err (!%p1519_p10)
}
 0x17e   : > { %s1594_s22 = smov 128   ;;  %s1595_s24 = smov 8  }
 0x17f   : > { %1327 = dma.vmem_to_hbm [thread:$0]  (%p1983_p12), %s1912_s8, 1024, %s1910_s10, %s983_s15, %s1594_s22, %s1594_s22, %s1595_s24  }
 0x180 PF: > { %s1012_s26 = sand.u32 1, %s1561_s12   ;;  %p1984_p3 = scmp.ne.s32.totalorder %s1976_s23, 0 }
 0x181   : > { %p1985_p5 = scmp.ge.s32.totalorder %s1581_s17, 2  ;;  %s1013_s9 = scalar_lea.sflag [#allocation5], %s1012_s26 }
 0x183   : > { %p1341_p9 = pnand %p1985_p5, %p1984_p3 }
 0x185   : > { %1556 = dma.done.wait (!%p1341_p9), %s1013_s9, 1024  }
 0x186   : > { %1558 = vsyncadd (!%p1341_p9), %s1013_s9, 4294966272  ;;  %s20_s17 = sadd.s32 1, %s1581_s17   ;;  %s1986_s12 = smov %s1565_s13 }
 0x187   : > { %p17_p11 = scmp.ge.s32.totalorder %s20_s17, 4   ;;  %s1987_s13 = smov %s1569_s14 }
 0x188   : > { %s1988_s14 = smov %s1758_s5  ;;  %s1989_s15 = smov %s1577_s16 }
 0x189   : > { %s1990_s16 = smov %s1992_s19  ;;  %19 = sbr.rel (!%p17_p11) target bundleno = 7 (0x7), region = 108 }
 0x190   :  { %1018 = vsyncpa [#allocation4], 1 }
 0x191   :  { %1020 = vsyncpa [#allocation4 + $0x1], 1 }
 0x192   :  { %1021 = vsyncpa [#allocation7], 1 }
 0x193   :  { %1022 = vsyncpa [#allocation5], 1 }
 0x194   :  { %1024 = vsyncpa [#allocation5 + $0x1], 1 }

</bundles_post_ra>
